<compile_context>
chip_gen: v7x
topology: tpu7x:2x2x1
jax: 0.10.0
libtpu: 0.0.40
codegen_flags: <defaults>
</compile_context>

<pallas_src>
import jax
import jax.numpy as jnp
from jax.experimental import pallas as pl
from jax.experimental.pallas import tpu as pltpu

LANES = 128          # vreg lane width
TM_MAX = 2048        # max row tile: 2048*128*4B = 1 MiB/buffer, safe on v5e/v6e/v7x
_MIN_PALLAS_ELEMS = 1024  # below this, kernel launch overhead can never win


def linear_kernel(x_ref, wb_ref, o_ref):
    # wb_ref: (2,) f32 in SMEM -> scalars; x_ref/o_ref: (TM, 128) VMEM tiles.
    w = wb_ref[0]
    b = wb_ref[1]
    # Pure VPU fma; explicit downcast in case x/o are bf16.
    o_ref[...] = (x_ref[...].astype(jnp.float32) * w + b).astype(o_ref.dtype)


def linear_forward(x, w, b, *, min_pallas_elems=_MIN_PALLAS_ELEMS):
    """y = x @ w.T + b for w:(1,1), b:(1,), x:(N,1)."""
    n, in_features = x.shape
    assert in_features == 1

    # Tiny-input fast path: one grid step of fixed overhead would dominate.
    if n * in_features < min_pallas_elems:
        return (x * w[0, 0] + b[0]).astype(x.dtype)

    # Fold the two parameters into one SMEM operand.
    wb = jnp.concatenate([w.reshape(-1), b.reshape(-1)]).astype(jnp.float32)

    # --- lane-dense repack: [N, 1] -> [M_pad, 128] slab ---------------------
    flat = x.reshape(-1)
    m = pl.cdiv(flat.shape[0], LANES)          # rows of the 128-lane slab
    tm = min(TM_MAX, ((m + 7) // 8) * 8)       # row tile, multiple of 8
    grid_m = pl.cdiv(m, tm)
    m_pad = grid_m * tm                        # avoid partial blocks
    total = m_pad * LANES
    flat = jnp.pad(flat, (0, total - flat.shape[0]))
    slab = flat.reshape(m_pad, LANES)

    out = pl.pallas_call(
        linear_kernel,
        out_shape=jax.ShapeDtypeStruct((m_pad, LANES), x.dtype),
        grid=(grid_m,),
        in_specs=[
            pl.BlockSpec((tm, LANES), lambda i: (i, 0)),             # x tile (VMEM)
            pl.BlockSpec(memory_space=pltpu.MemorySpace.SMEM),       # (w, b) scalars
        ],
        out_specs=pl.BlockSpec((tm, LANES), lambda i: (i, 0)),
        compiler_params=pltpu.CompilerParams(
            dimension_semantics=("parallel",),       # shard rows across TCs (v7x)
            vmem_limit_bytes=32 * 1024 * 1024,       # explicit; <= scoped cap on all gens
        ),
    )(slab, wb)

    # Trim padding and restore the original [N, 1] layout.
    return out.reshape(-1)[: n * in_features].reshape(n, 1)


if __name__ == "__main__":
    key = jax.random.PRNGKey(0)
    kx, kw, kb = jax.random.split(key, 3)

    # Deterministic parameter init matching torch.nn.Linear(1, 1):
    # uniform(-1/sqrt(fan_in), 1/sqrt(fan_in)) with fan_in = 1 -> U(-1, 1)
    w = jax.random.uniform(kw, (1, 1), jnp.float32, minval=-1.0, maxval=1.0)
    b = jax.random.uniform(kb, (1,), jnp.float32, minval=-1.0, maxval=1.0)

    # Small batch consistent with Linear(1, 1): takes the tiny-input XLA path.
    x_small = jax.random.normal(kx, (8, 1), jnp.float32)
    out_small = linear_forward(x_small, w, b)

    # Larger (but still small) batch to exercise the lane-dense tiled Pallas
    # kernel, including pad-to-slab and trim of the ragged tail.
    x_big = jax.random.normal(kx, (5000, 1), jnp.float32)
    out_big = linear_forward(x_big, w, b)

    out_small, out_big = jax.block_until_ready((out_small, out_big))

    # Reference check in plain JAX
    ref_small = x_small @ w.T + b
    ref_big = x_big @ w.T + b
    assert out_small.shape == (8, 1)
    assert out_big.shape == (5000, 1)
    assert jnp.allclose(out_small, ref_small, atol=1e-6), "small-path mismatch"
    assert jnp.allclose(out_big, ref_big, atol=1e-6), "pallas-path mismatch"

    print("KERNEL_OK")
</pallas_src>

<mosaic_0001>
module attributes {stable_mosaic.version = 11 : i64} {
  func.func @linear_kernel(%arg0: i32, %arg1: memref<40x128xf32, #tpu.memory_space<vmem>>, %arg2: memref<2xf32, #tpu.memory_space<smem>>, %arg3: memref<40x128xf32, #tpu.memory_space<vmem>>) attributes {dimension_semantics = [#tpu.dimension_semantics<parallel>], iteration_bounds = array<i64: 1>, scalar_prefetch = 0 : i64, scratch_operands = 0 : i64, tpu.core_type = #tpu.core_type<tc>, window_params = [{transform_indices = @transform_0, window_bounds = array<i64: 40, 128>}, {transform_indices = @transform_1, window_bounds = array<i64: 2>}, {transform_indices = @transform_2, window_bounds = array<i64: 40, 128>}]} {
    %c0 = arith.constant 0 : index
    %0 = memref.load %arg2[%c0] : memref<2xf32, #tpu.memory_space<smem>>
    %c1 = arith.constant 1 : index
    %1 = memref.load %arg2[%c1] : memref<2xf32, #tpu.memory_space<smem>>
    %c0_0 = arith.constant 0 : index
    %c0_1 = arith.constant 0 : index
    %2 = vector.load %arg1[%c0_0, %c0_1] : memref<40x128xf32, #tpu.memory_space<vmem>>, vector<40x128xf32>
    %3 = vector.broadcast %0 : f32 to vector<40x128xf32>
    %4 = arith.mulf %2, %3 : vector<40x128xf32>
    %5 = vector.broadcast %1 : f32 to vector<40x128xf32>
    %6 = arith.addf %4, %5 : vector<40x128xf32>
    %c0_2 = arith.constant 0 : index
    %c0_3 = arith.constant 0 : index
    %7 = vector.load %arg3[%c0_2, %c0_3] : memref<40x128xf32, #tpu.memory_space<vmem>>, vector<40x128xf32>
    tpu.vector_store %arg3[%c0_2, %c0_3], %6 {strides = array<i32>} : memref<40x128xf32, #tpu.memory_space<vmem>>, vector<40x128xf32>,
    return
  }
  func.func @transform_0(%arg0: i32) -> (i32, i32) {
    %c0_i32 = arith.constant 0 : i32
    %c0_i32_0 = arith.constant 0 : i32
    return %arg0, %c0_i32 : i32, i32
  }
  func.func @transform_1(%arg0: i32) -> i32 {
    %c0_i32 = arith.constant 0 : i32
    %c0_i32_0 = arith.constant 0 : i32
    return %c0_i32 : i32
  }
  func.func @transform_2(%arg0: i32) -> (i32, i32) {
    %c0_i32 = arith.constant 0 : i32
    %c0_i32_0 = arith.constant 0 : i32
    return %arg0, %c0_i32 : i32, i32
  }
}

</mosaic_0001>

<bundles_post_ra>
// kernel: tpu_custom_call.1
= control target key start
LH: loop header
LB: loop body
LE: loop exit
PB: predicated region body
PF: predicated region fallthrough
CT: control target
= control target key end

     0   :  { %7 = vsyncpa [#allocation3], 0  ;;  %s202_s0 = inlined_call_operand.hbm [shape: f32[40,128], index: 0, kind: input, shape index: {}]   ;;  %s203_s1 = inlined_call_operand.vmem [shape: f32[2], index: 1, kind: input, shape index: {}]   ;;  %s204_s2 = inlined_call_operand.hbm [shape: f32[40,128], index: 2, kind: output, shape index: {}]  }
   0x1   :  { %8 = vsyncpa [#allocation5], 0 }
   0x2   :  { %9 = vsyncpa [#allocation4], 0  ;;  %s149_s9 = smov [#allocation2]   ;;  %s28_s13 = sshll.u32 %s203_s1, 4  ;;  %s29_s13 = int_to_ptr.vmem [resolvable:$true] %s28_s13 }
   0x3   :  { %s15_s10 = sshll.u32 %s149_s9, 4  ;;  %s87_s16 = scalar_lea.hbm %s202_s0, 640  ;;  %s16_s10 = int_to_ptr.vmem [resolvable:$true] %s15_s10 }
   0x4   :  { %p88_p0 = scmp.ne.s32.totalorder %s202_s0, %s87_s16  ;;  %p91_p1 = scmp.lt.u32.totalorder %s87_s16, %s202_s0 }
   0x6   :  { %p93_p2 = pnand %p91_p1, %p88_p0 }
   0x8   :  { %96 = shalt.err (!%p93_p2)
}
   0x9   :  { %s97_s21 = scalar_lea.vmem %s16_s10, 640  ;;  %p102_p4 = scmp.lt.s32.totalorder %s16_s10, %s16_s10 }
   0xa   :  { %p98_p3 = scmp.ne.s32.totalorder %s16_s10, %s97_s21  ;;  %p103_p5 = scmp.lt.s32.totalorder %s97_s21, %s97_s21 }
   0xc   :  { %p104_p6 = por %p103_p5, %p102_p4 }
   0xe   :  { %p105_p7 = pnand %p104_p6, %p98_p3 }
  0x10   :  { %108 = shalt.err (!%p105_p7)
}
  0x11   :  { %s150_s1 = smov 128   ;;  %s151_s22 = smov 8  }
  0x12   :  { %21 = dma.hbm_to_vmem [thread:$0]  %s202_s0, 640, %s16_s10, [#allocation3], %s150_s1, %s150_s1, %s151_s22  }
  0x13   :  { %s109_s25 = scalar_lea.vmem %s29_s13, 16  ;;  %p114_p9 = scmp.lt.s32.totalorder %s29_s13, %s29_s13 }
  0x14   :  { %p110_p8 = scmp.ne.s32.totalorder %s29_s13, %s109_s25  ;;  %p115_p10 = scmp.lt.s32.totalorder %s109_s25, %s109_s25 }
  0x16   :  { %p116_p11 = por %p115_p10, %p114_p9 }
  0x18   :  { %p117_p12 = pnand %p116_p11, %p110_p8 }
  0x1a   :  { %120 = shalt.err (!%p117_p12)
}
  0x1b   :  { %s152_s26 = smov [#allocation6]  }
  0x1c   :  { %31 = dma.vmem_to_smem %s29_s13, 16, %s152_s26, [#allocation5]  }
  0x1d   :  { %143 = dma.done.wait [#allocation3], 640  }
  0x1e   :  { %144 = vsyncadd [#allocation3], 4294966656 }
  0x1f   :  { %145 = dma.done.wait [#allocation5], 16  }
  0x20   :  { %146 = vsyncadd [#allocation5], 4294967280 }
  0x21   :  { %38 = sfence }
  0x22   :  { %s39_s27 = sld [smem:[#allocation6]]  ;;  %s81_s28 = sld [smem:[#allocation6 + $0x1]]  ;;  %v41_v0 = vld [vmem:[#allocation2] sm:$0xff]  ;;  %v42_v1 = vld [vmem:[#allocation2 + $0x8] sm:$0xff]  ;;  %v43_v2 = vld [vmem:[#allocation2 + $0x10] sm:$0xff] }
  0x23   :  { %v44_v3 = vld [vmem:[#allocation2 + $0x18] sm:$0xff]  ;;  %v45_v4 = vld [vmem:[#allocation2 + $0x20] sm:$0xff]  ;;  %s153_s0 = smov [#allocation7]  }
  0x24   :  { %s68_s29 = sshll.u32 %s153_s0, 4  ;;  %s69_s29 = int_to_ptr.vmem [resolvable:$true] %s68_s29 }
  0x25   :  { %s121_s30 = scalar_lea.vmem %s69_s29, 640  ;;  %p126_p0 = scmp.lt.s32.totalorder %s69_s29, %s69_s29 }
  0x26   :  { %p122_p13 = scmp.ne.s32.totalorder %s69_s29, %s121_s30  ;;  %p127_p1 = scmp.lt.s32.totalorder %s121_s30, %s121_s30 }
  0x28   :  { %v46_v5 = vstv %s39_s27  ;;  %v52_v6 = vstv %s81_s28  ;;  %p128_p2 = por %p127_p1, %p126_p0 }
  0x29   :  { %v47_v7 = vmul.f32 %v46_v5, %v41_v0  ;;  %v48_v8 = vmul.f32 %v46_v5, %v42_v1  ;;  %v49_v9 = vmul.f32 %v46_v5, %v43_v2  ;;  %v50_v10 = vmul.f32 %v46_v5, %v44_v3 }
  0x2a   :  { %v51_v11 = vmul.f32 %v46_v5, %v45_v4  ;;  %p129_p3 = pnand %p128_p2, %p122_p13 }
  0x2b   :  { %v53_v12 = vadd.f32 %v52_v6, %v47_v7  ;;  %v54_v13 = vadd.f32 %v52_v6, %v48_v8  ;;  %v55_v14 = vadd.f32 %v52_v6, %v49_v9  ;;  %v56_v15 = vadd.f32 %v52_v6, %v50_v10 }
  0x2c   :  { %v57_v16 = vadd.f32 %v52_v6, %v51_v11 }
  0x2d   :  { %58 = vst [vmem:[#allocation7] sm:$0xff] %v53_v12  ;;  %59 = vst [vmem:[#allocation7 + $0x8] sm:$0xff] %v54_v13 }
  0x2e   :  { %60 = vst [vmem:[#allocation7 + $0x10] sm:$0xff] %v55_v14  ;;  %61 = vst [vmem:[#allocation7 + $0x18] sm:$0xff] %v56_v15 }
  0x2f   :  { %62 = vst [vmem:[#allocation7 + $0x20] sm:$0xff] %v57_v16 }
  0x30   :  { %132 = shalt.err (!%p129_p3)
}
  0x31   :  { %s133_s5 = scalar_lea.hbm %s204_s2, 640 }
  0x32   :  { %p134_p4 = scmp.ne.s32.totalorder %s204_s2, %s133_s5  ;;  %p137_p5 = scmp.lt.u32.totalorder %s133_s5, %s204_s2 }
  0x34   :  { %p139_p6 = pnand %p137_p5, %p134_p4 }
  0x36   :  { %142 = shalt.err (!%p139_p6)
}
  0x37   :  { %74 = dma.vmem_to_hbm [thread:$0]  %s69_s29, 640, %s204_s2, [#allocation4], %s150_s1, %s150_s1, %s151_s22  }
  0x38   :  { %147 = dma.done.wait [#allocation4], 640  }
  0x39   :  { %148 = vsyncadd [#allocation4], 4294966656 }
  0x3a   :  { %78 = vsyncpa [#allocation3], 1 }
  0x3b   :  { %79 = vsyncpa [#allocation4], 1 }
  0x3c   :  { %80 = vsyncpa [#allocation5], 1 }

</bundles_post_ra>
